<compile_context>
chip_gen: v6e
topology: v6e:2x2x1
jax: 0.10.0
libtpu: 0.0.40
codegen_flags: <defaults>
</compile_context>

<pallas_src>
import functools

import numpy as np
import jax
import jax.numpy as jnp
from jax.experimental import pallas as pl
from jax.experimental.pallas import tpu as pltpu

# Lane-aligned halo width (elements) before/after each flattened image in the
# VMEM scratch. Must be >= W+1 and a multiple of 128 so the pad-strip zeroing
# and image copy are lane-aligned dense stores.
_PAD = 128


def _resblock_kernel(x_ref, w1_ref, b1_ref, w2_ref, b2_ref, o_ref, xpad_ref,
                     *, H, W):
    """Fused conv3x3 + ReLU + conv1x1 + residual + ReLU for Bt images.

    x_ref:    (Bt, Cin, H*W)            f32   images, channel-major, spatial on lanes
    w1_ref:   (Cmid, 9*Cin)             bf16  3x3 weight, columns ordered (ky, kx, cin)
    b1_ref:   (Cmid, 1)                 f32
    w2_ref:   (Cin, Cmid)               bf16  1x1 weight
    b2_ref:   (Cin, 1)                  f32
    o_ref:    (Bt, Cin, H*W)            f32   output, same layout as x
    xpad_ref: (Bt, Cin, 2*_PAD + H*W)   f32   scratch: per-image zero-padded rows
    """
    Bt, Cin, P = x_ref.shape
    Cmid = w1_ref.shape[0]

    # Refresh only the two halo strips (the image region below is fully
    # overwritten) -> 2*_PAD columns of stores instead of 2*_PAD + P.
    # NOTE: do NOT gate this on program_id == 0 -- with the batch axis marked
    # "parallel" each core owns a distinct scratch instance.
    xpad_ref[:, :, :_PAD] = jnp.zeros((Bt, Cin, _PAD), jnp.float32)
    xpad_ref[:, :, _PAD + P:] = jnp.zeros((Bt, Cin, _PAD), jnp.float32)

    # Copy all Bt images into the padded scratch with one dense, lane-aligned
    # store (no HBM round trip for the halo).
    xpad_ref[:, :, _PAD:_PAD + P] = x_ref[...]

    # Grid-invariant horizontal border masks on a (1, P) iota; broadcast over
    # the Cin sublanes is free. Use & (W-1) when W is a power of two.
    lane = jax.lax.broadcasted_iota(jnp.int32, (1, P), 1)
    wpos = (lane & (W - 1)) if (W & (W - 1)) == 0 else (lane % W)
    not_left = wpos > 0
    not_right = wpos < (W - 1)

    def tap(b, ky, kx):
        # tap(ky,kx)[c, h*W+w] = xpad[b, c, _PAD + (h+ky-1)*W + (w+kx-1)]
        # Vertical out-of-range reads land in the zero halo; horizontal wrap
        # at the image border is masked for the kx==0 / kx==2 taps.
        s = _PAD - W - 1 + ky * W + kx           # static lane offset
        t = xpad_ref[b, :, s:s + P]              # (Cin, P) f32
        if kx == 0:
            t = jnp.where(not_left, t, 0.0)
        elif kx == 2:
            t = jnp.where(not_right, t, 0.0)
        # Cast per tap -> never materialize a full f32 im2col intermediate.
        return t.astype(jnp.bfloat16)

    def tap_all(ky, kx):
        ts = [tap(b, ky, kx) for b in range(Bt)]
        return ts[0] if Bt == 1 else jnp.concatenate(ts, axis=1)  # (Cin, Bt*P)

    if Cin < 64:
        # Tiny channel counts: one K = 9*Cin MXU matmul with N = Bt*P.
        cols = jnp.concatenate(
            [tap_all(ky, kx) for ky in range(3) for kx in range(3)],
            axis=0)                                            # (9*Cin, Bt*P) bf16
        h = jnp.dot(w1_ref[...], cols, preferred_element_type=jnp.float32)
    else:
        # Real encoder sizes: 9 accumulating K = Cin matmuls -- avoids the 9x
        # im2col buffer (the dominant VMEM consumer on v7x's 64 MiB VMEM).
        w1 = w1_ref[...]
        h = jnp.zeros((Cmid, Bt * P), jnp.float32)
        t_idx = 0
        for ky in range(3):
            for kx in range(3):
                h = h + jnp.dot(w1[:, t_idx * Cin:(t_idx + 1) * Cin],
                                tap_all(ky, kx),
                                preferred_element_type=jnp.float32)
                t_idx += 1

    # conv3x3 bias + ReLU (f32), then conv1x1 (bf16 in, f32 acc).
    h = jnp.maximum(h + b1_ref[...], 0.0)                       # (Cmid, Bt*P)
    y = jnp.dot(w2_ref[...], h.astype(jnp.bfloat16),
                preferred_element_type=jnp.float32)             # (Cin, Bt*P)

    # Bias + residual + ReLU per image; lane-dense (width P) unmasked stores.
    for b in range(Bt):
        o_ref[b] = jnp.maximum(
            y[:, b * P:(b + 1) * P] + b2_ref[...] + x_ref[b], 0.0
        ).astype(o_ref.dtype)


def _pick_images_per_step(B, Cin, Cmid, P):
    """Largest divisor of B whose per-step intermediates fit a modest VMEM
    budget, preferring >= 8 grid steps when the batch allows (pipeline overlap
    / megacore sharding); small batches just run in one step."""
    budget = 8 << 20  # ~8 MiB of per-step intermediates

    def per_step_bytes(bt):
        return bt * (Cin * (2 * _PAD + P) * 4      # padded image scratch (f32)
                     + 9 * Cin * P * 2             # bf16 im2col operand
                     + (Cmid + 2 * Cin) * P * 4)   # h, y, out tiles (f32)

    divisors = [d for d in range(1, B + 1)
                if B % d == 0 and per_step_bytes(d) <= budget]
    if not divisors:
        return 1
    with_steps = [d for d in divisors if B // d >= 8]
    return max(with_steps) if with_steps else max(divisors)


def resblock_forward_pallas(x_nchw, w1_oihw, b1, w2_oihw, b2):
    """ResBlock forward on NCHW input; returns NCHW output."""
    B, Cin, H, W = x_nchw.shape
    Cmid = w1_oihw.shape[0]
    P = H * W
    assert W + 1 <= _PAD, "image width too large for the flat-pad scratch"

    Bt = _pick_images_per_step(B, Cin, Cmid, P)

    # Free reshapes / one-time weight packing -- no transposes or jnp.pad on
    # the feature map in HBM.
    x_flat = x_nchw.reshape(B, Cin, P).astype(jnp.float32)
    w1_mat = (jnp.transpose(w1_oihw, (0, 2, 3, 1))        # (Cmid, 3, 3, Cin)
              .reshape(Cmid, 9 * Cin).astype(jnp.bfloat16))
    w2_mat = w2_oihw.reshape(Cin, Cmid).astype(jnp.bfloat16)
    b1_col = b1.reshape(Cmid, 1).astype(jnp.float32)
    b2_col = b2.reshape(Cin, 1).astype(jnp.float32)

    flops = 2 * B * P * Cin * Cmid * 10                   # 9 MACs (3x3) + 1 (1x1)
    bytes_accessed = (2 * B * Cin * P * 4                 # x in + out (f32)
                      + (9 * Cin * Cmid + Cin * Cmid) * 2 # bf16 weights
                      + (Cmid + Cin) * 4)                 # biases

    kernel = functools.partial(_resblock_kernel, H=H, W=W)
    out_flat = pl.pallas_call(
        kernel,
        out_shape=jax.ShapeDtypeStruct((B, Cin, P), jnp.float32),
        grid=(B // Bt,),
        in_specs=[
            pl.BlockSpec((Bt, Cin, P), lambda i: (i, 0, 0)),   # Bt images / step
            pl.BlockSpec((Cmid, 9 * Cin), lambda i: (0, 0)),   # weights fetched once
            pl.BlockSpec((Cmid, 1), lambda i: (0, 0)),
            pl.BlockSpec((Cin, Cmid), lambda i: (0, 0)),
            pl.BlockSpec((Cin, 1), lambda i: (0, 0)),
        ],
        out_specs=pl.BlockSpec((Bt, Cin, P), lambda i: (i, 0, 0)),
        scratch_shapes=[pltpu.VMEM((Bt, Cin, 2 * _PAD + P), jnp.float32)],
        compiler_params=pltpu.CompilerParams(
            dimension_semantics=("parallel",),   # batch steps across TCs (v7x)
            vmem_limit_bytes=32 * 1024 * 1024,   # raise on v5e/v6e for big maps
        ),
        cost_estimate=pl.CostEstimate(flops=flops, transcendentals=0,
                                      bytes_accessed=bytes_accessed),
    )(x_flat, w1_mat, b1_col, w2_mat, b2_col)
    # TODO(synk): for large H*W add an H-row grid axis with a 1-row halo so the
    # per-step tile stays within v7x's 64 MiB VMEM; whole-image tiles are fine
    # at the VQ-VAE feature-map sizes used here.
    return out_flat.reshape(B, Cin, H, W).astype(x_nchw.dtype)


class ResBlockPallas:
    """JAX/Pallas port of the PyTorch ResBlock:
       out = relu(conv1x1(relu(conv3x3(x))) + x)."""

    def __init__(self, input_channels, channel, key=None):
        if key is None:
            key = jax.random.PRNGKey(0)
        k1, k2, k3, k4 = jax.random.split(key, 4)
        bound1 = 1.0 / np.sqrt(input_channels * 3 * 3)
        self.w1 = jax.random.uniform(k1, (channel, input_channels, 3, 3),
                                     jnp.float32, -bound1, bound1)
        self.b1 = jax.random.uniform(k2, (channel,), jnp.float32, -bound1, bound1)
        bound2 = 1.0 / np.sqrt(channel)
        self.w2 = jax.random.uniform(k3, (input_channels, channel, 1, 1),
                                     jnp.float32, -bound2, bound2)
        self.b2 = jax.random.uniform(k4, (input_channels,), jnp.float32,
                                     -bound2, bound2)

    def __call__(self, x_BCHW):
        return resblock_forward_pallas(x_BCHW, self.w1, self.b1, self.w2, self.b2)


def _resblock_reference(x, w1, b1, w2, b2):
    """Pure-JAX (lax conv) reference for correctness checking."""
    h = jax.lax.conv_general_dilated(
        x, w1, window_strides=(1, 1), padding=((1, 1), (1, 1)),
        dimension_numbers=("NCHW", "OIHW", "NCHW")) + b1.reshape(1, -1, 1, 1)
    h = jnp.maximum(h, 0.0)
    y = jax.lax.conv_general_dilated(
        h, w2, window_strides=(1, 1), padding=((0, 0), (0, 0)),
        dimension_numbers=("NCHW", "OIHW", "NCHW")) + b2.reshape(1, -1, 1, 1)
    return jnp.maximum(y + x, 0.0)


if __name__ == "__main__":
    key = jax.random.PRNGKey(0)
    k_x, k_params = jax.random.split(key)

    B, Cin, Cmid, H, W = 2, 8, 32, 16, 16   # H*W = 256 -> lane-dense layout
    x = jax.random.normal(k_x, (B, Cin, H, W), jnp.float32)

    block = ResBlockPallas(input_channels=Cin, channel=Cmid, key=k_params)

    out = jax.block_until_ready(block(x))
    ref = jax.block_until_ready(
        _resblock_reference(x, block.w1, block.b1, block.w2, block.b2))

    assert out.shape == (B, Cin, H, W)
    # bf16 MXU operands (f32 accumulate) -> compare against the f32 reference
    # with a bf16-level tolerance.
    np.testing.assert_allclose(np.asarray(out), np.asarray(ref),
                               atol=2e-2, rtol=2e-2)
    print("KERNEL_OK")
</pallas_src>

<mosaic_0001>
module attributes {stable_mosaic.version = 11 : i64} {
  func.func @_resblock_kernel(%arg0: i32, %arg1: memref<2x8x256xf32, #tpu.memory_space<vmem>>, %arg2: memref<32x72xbf16, #tpu.memory_space<vmem>>, %arg3: memref<32x1xf32, #tpu.memory_space<vmem>>, %arg4: memref<8x32xbf16, #tpu.memory_space<vmem>>, %arg5: memref<8x1xf32, #tpu.memory_space<vmem>>, %arg6: memref<2x8x256xf32, #tpu.memory_space<vmem>>, %arg7: memref<2x8x512xf32, #tpu.memory_space<vmem>>) attributes {dimension_semantics = [#tpu.dimension_semantics<parallel>], iteration_bounds = array<i64: 1>, scalar_prefetch = 0 : i64, scratch_operands = 1 : i64, tpu.core_type = #tpu.core_type<tc>, window_params = [{transform_indices = @transform_0, window_bounds = array<i64: 2, 8, 256>}, {pipeline_mode = #tpu.pipeline_mode<synchronous>, transform_indices = @transform_1, window_bounds = array<i64: 32, 72>}, {pipeline_mode = #tpu.pipeline_mode<synchronous>, transform_indices = @transform_2, window_bounds = array<i64: 32, 1>}, {pipeline_mode = #tpu.pipeline_mode<synchronous>, transform_indices = @transform_3, window_bounds = array<i64: 8, 32>}, {pipeline_mode = #tpu.pipeline_mode<synchronous>, transform_indices = @transform_4, window_bounds = array<i64: 8, 1>}, {transform_indices = @transform_5, window_bounds = array<i64: 2, 8, 256>}]} {
    %cst = arith.constant 0.000000e+00 : f32
    %0 = vector.broadcast %cst : f32 to vector<2x8x128xf32>
    %c0 = arith.constant 0 : index
    %c0_0 = arith.constant 0 : index
    %c0_1 = arith.constant 0 : index
    %1 = vector.load %arg7[%c0, %c0_0, %c0_1] : memref<2x8x512xf32, #tpu.memory_space<vmem>>, vector<2x8x128xf32>
    tpu.vector_store %arg7[%c0, %c0_0, %c0_1], %0 {strides = array<i32>} : memref<2x8x512xf32, #tpu.memory_space<vmem>>, vector<2x8x128xf32>,
    %cst_2 = arith.constant 0.000000e+00 : f32
    %2 = vector.broadcast %cst_2 : f32 to vector<2x8x128xf32>
    %c0_3 = arith.constant 0 : index
    %c0_4 = arith.constant 0 : index
    %c384 = arith.constant 384 : index
    %3 = vector.load %arg7[%c0_3, %c0_4, %c384] : memref<2x8x512xf32, #tpu.memory_space<vmem>>, vector<2x8x128xf32>
    tpu.vector_store %arg7[%c0_3, %c0_4, %c384], %2 {strides = array<i32>} : memref<2x8x512xf32, #tpu.memory_space<vmem>>, vector<2x8x128xf32>,
    %c0_5 = arith.constant 0 : index
    %c0_6 = arith.constant 0 : index
    %c0_7 = arith.constant 0 : index
    %4 = vector.load %arg1[%c0_5, %c0_6, %c0_7] : memref<2x8x256xf32, #tpu.memory_space<vmem>>, vector<2x8x256xf32>
    %c0_8 = arith.constant 0 : index
    %c0_9 = arith.constant 0 : index
    %c128 = arith.constant 128 : index
    %5 = vector.load %arg7[%c0_8, %c0_9, %c128] : memref<2x8x512xf32, #tpu.memory_space<vmem>>, vector<2x8x256xf32>
    tpu.vector_store %arg7[%c0_8, %c0_9, %c128], %4 {strides = array<i32>} : memref<2x8x512xf32, #tpu.memory_space<vmem>>, vector<2x8x256xf32>,
    %6 = tpu.iota {dimensions = array<i32: 1>} : vector<1x256xi32>
    %c15_i32 = arith.constant 15 : i32
    %7 = vector.broadcast %c15_i32 : i32 to vector<1x256xi32>
    %8 = arith.andi %6, %7 : vector<1x256xi32>
    %c0_i32 = arith.constant 0 : i32
    %9 = vector.broadcast %c0_i32 : i32 to vector<1x256xi32>
    %10 = arith.cmpi sgt, %8, %9 : vector<1x256xi32>
    %c15_i32_10 = arith.constant 15 : i32
    %11 = vector.broadcast %c15_i32_10 : i32 to vector<1x256xi32>
    %12 = arith.cmpi slt, %8, %11 : vector<1x256xi32>
    %c0_11 = arith.constant 0 : index
    %c0_12 = arith.constant 0 : index
    %c111 = arith.constant 111 : index
    %13 = vector.load %arg7[%c0_11, %c0_12, %c111] : memref<2x8x512xf32, #tpu.memory_space<vmem>>, vector<1x8x256xf32>
    %14 = vector.shape_cast %13 : vector<1x8x256xf32> to vector<8x256xf32>
    %cst_13 = arith.constant 0.000000e+00 : f32
    %15 = vector.shape_cast %10 : vector<1x256xi1> to vector<1x256xi1>
    %16 = vector.broadcast %15 : vector<1x256xi1> to vector<8x256xi1>
    %17 = vector.broadcast %cst_13 : f32 to vector<8x256xf32>
    %18 = arith.select %16, %14, %17 : vector<8x256xi1>, vector<8x256xf32>
    %19 = arith.truncf %18 : vector<8x256xf32> to vector<8x256xbf16>
    %c1 = arith.constant 1 : index
    %c0_14 = arith.constant 0 : index
    %c111_15 = arith.constant 111 : index
    %20 = vector.load %arg7[%c1, %c0_14, %c111_15] : memref<2x8x512xf32, #tpu.memory_space<vmem>>, vector<1x8x256xf32>
    %21 = vector.shape_cast %20 : vector<1x8x256xf32> to vector<8x256xf32>
    %cst_16 = arith.constant 0.000000e+00 : f32
    %22 = vector.shape_cast %10 : vector<1x256xi1> to vector<1x256xi1>
    %23 = vector.broadcast %22 : vector<1x256xi1> to vector<8x256xi1>
    %24 = vector.broadcast %cst_16 : f32 to vector<8x256xf32>
    %25 = arith.select %23, %21, %24 : vector<8x256xi1>, vector<8x256xf32>
    %26 = arith.truncf %25 : vector<8x256xf32> to vector<8x256xbf16>
    %27 = tpu.concatenate %19, %26 in 1 : vector<8x256xbf16>, vector<8x256xbf16> -> vector<8x512xbf16>
    %c0_17 = arith.constant 0 : index
    %c0_18 = arith.constant 0 : index
    %c112 = arith.constant 112 : index
    %28 = vector.load %arg7[%c0_17, %c0_18, %c112] : memref<2x8x512xf32, #tpu.memory_space<vmem>>, vector<1x8x256xf32>
    %29 = vector.shape_cast %28 : vector<1x8x256xf32> to vector<8x256xf32>
    %30 = arith.truncf %29 : vector<8x256xf32> to vector<8x256xbf16>
    %c1_19 = arith.constant 1 : index
    %c0_20 = arith.constant 0 : index
    %c112_21 = arith.constant 112 : index
    %31 = vector.load %arg7[%c1_19, %c0_20, %c112_21] : memref<2x8x512xf32, #tpu.memory_space<vmem>>, vector<1x8x256xf32>
    %32 = vector.shape_cast %31 : vector<1x8x256xf32> to vector<8x256xf32>
    %33 = arith.truncf %32 : vector<8x256xf32> to vector<8x256xbf16>
    %34 = tpu.concatenate %30, %33 in 1 : vector<8x256xbf16>, vector<8x256xbf16> -> vector<8x512xbf16>
    %c0_22 = arith.constant 0 : index
    %c0_23 = arith.constant 0 : index
    %c113 = arith.constant 113 : index
    %35 = vector.load %arg7[%c0_22, %c0_23, %c113] : memref<2x8x512xf32, #tpu.memory_space<vmem>>, vector<1x8x256xf32>
    %36 = vector.shape_cast %35 : vector<1x8x256xf32> to vector<8x256xf32>
    %cst_24 = arith.constant 0.000000e+00 : f32
    %37 = vector.shape_cast %12 : vector<1x256xi1> to vector<1x256xi1>
    %38 = vector.broadcast %37 : vector<1x256xi1> to vector<8x256xi1>
    %39 = vector.broadcast %cst_24 : f32 to vector<8x256xf32>
    %40 = arith.select %38, %36, %39 : vector<8x256xi1>, vector<8x256xf32>
    %41 = arith.truncf %40 : vector<8x256xf32> to vector<8x256xbf16>
    %c1_25 = arith.constant 1 : index
    %c0_26 = arith.constant 0 : index
    %c113_27 = arith.constant 113 : index
    %42 = vector.load %arg7[%c1_25, %c0_26, %c113_27] : memref<2x8x512xf32, #tpu.memory_space<vmem>>, vector<1x8x256xf32>
    %43 = vector.shape_cast %42 : vector<1x8x256xf32> to vector<8x256xf32>
    %cst_28 = arith.constant 0.000000e+00 : f32
    %44 = vector.shape_cast %12 : vector<1x256xi1> to vector<1x256xi1>
    %45 = vector.broadcast %44 : vector<1x256xi1> to vector<8x256xi1>
    %46 = vector.broadcast %cst_28 : f32 to vector<8x256xf32>
    %47 = arith.select %45, %43, %46 : vector<8x256xi1>, vector<8x256xf32>
    %48 = arith.truncf %47 : vector<8x256xf32> to vector<8x256xbf16>
    %49 = tpu.concatenate %41, %48 in 1 : vector<8x256xbf16>, vector<8x256xbf16> -> vector<8x512xbf16>
    %c0_29 = arith.constant 0 : index
    %c0_30 = arith.constant 0 : index
    %c127 = arith.constant 127 : index
    %50 = vector.load %arg7[%c0_29, %c0_30, %c127] : memref<2x8x512xf32, #tpu.memory_space<vmem>>, vector<1x8x256xf32>
    %51 = vector.shape_cast %50 : vector<1x8x256xf32> to vector<8x256xf32>
    %cst_31 = arith.constant 0.000000e+00 : f32
    %52 = vector.shape_cast %10 : vector<1x256xi1> to vector<1x256xi1>
    %53 = vector.broadcast %52 : vector<1x256xi1> to vector<8x256xi1>
    %54 = vector.broadcast %cst_31 : f32 to vector<8x256xf32>
    %55 = arith.select %53, %51, %54 : vector<8x256xi1>, vector<8x256xf32>
    %56 = arith.truncf %55 : vector<8x256xf32> to vector<8x256xbf16>
    %c1_32 = arith.constant 1 : index
    %c0_33 = arith.constant 0 : index
    %c127_34 = arith.constant 127 : index
    %57 = vector.load %arg7[%c1_32, %c0_33, %c127_34] : memref<2x8x512xf32, #tpu.memory_space<vmem>>, vector<1x8x256xf32>
    %58 = vector.shape_cast %57 : vector<1x8x256xf32> to vector<8x256xf32>
    %cst_35 = arith.constant 0.000000e+00 : f32
    %59 = vector.shape_cast %10 : vector<1x256xi1> to vector<1x256xi1>
    %60 = vector.broadcast %59 : vector<1x256xi1> to vector<8x256xi1>
    %61 = vector.broadcast %cst_35 : f32 to vector<8x256xf32>
    %62 = arith.select %60, %58, %61 : vector<8x256xi1>, vector<8x256xf32>
    %63 = arith.truncf %62 : vector<8x256xf32> to vector<8x256xbf16>
    %64 = tpu.concatenate %56, %63 in 1 : vector<8x256xbf16>, vector<8x256xbf16> -> vector<8x512xbf16>
    %c0_36 = arith.constant 0 : index
    %c0_37 = arith.constant 0 : index
    %c128_38 = arith.constant 128 : index
    %65 = vector.load %arg7[%c0_36, %c0_37, %c128_38] : memref<2x8x512xf32, #tpu.memory_space<vmem>>, vector<1x8x256xf32>
    %66 = vector.shape_cast %65 : vector<1x8x256xf32> to vector<8x256xf32>
    %67 = arith.truncf %66 : vector<8x256xf32> to vector<8x256xbf16>
    %c1_39 = arith.constant 1 : index
    %c0_40 = arith.constant 0 : index
    %c128_41 = arith.constant 128 : index
    %68 = vector.load %arg7[%c1_39, %c0_40, %c128_41] : memref<2x8x512xf32, #tpu.memory_space<vmem>>, vector<1x8x256xf32>
    %69 = vector.shape_cast %68 : vector<1x8x256xf32> to vector<8x256xf32>
    %70 = arith.truncf %69 : vector<8x256xf32> to vector<8x256xbf16>
    %71 = tpu.concatenate %67, %70 in 1 : vector<8x256xbf16>, vector<8x256xbf16> -> vector<8x512xbf16>
    %c0_42 = arith.constant 0 : index
    %c0_43 = arith.constant 0 : index
    %c129 = arith.constant 129 : index
    %72 = vector.load %arg7[%c0_42, %c0_43, %c129] : memref<2x8x512xf32, #tpu.memory_space<vmem>>, vector<1x8x256xf32>
    %73 = vector.shape_cast %72 : vector<1x8x256xf32> to vector<8x256xf32>
    %cst_44 = arith.constant 0.000000e+00 : f32
    %74 = vector.shape_cast %12 : vector<1x256xi1> to vector<1x256xi1>
    %75 = vector.broadcast %74 : vector<1x256xi1> to vector<8x256xi1>
    %76 = vector.broadcast %cst_44 : f32 to vector<8x256xf32>
    %77 = arith.select %75, %73, %76 : vector<8x256xi1>, vector<8x256xf32>
    %78 = arith.truncf %77 : vector<8x256xf32> to vector<8x256xbf16>
    %c1_45 = arith.constant 1 : index
    %c0_46 = arith.constant 0 : index
    %c129_47 = arith.constant 129 : index
    %79 = vector.load %arg7[%c1_45, %c0_46, %c129_47] : memref<2x8x512xf32, #tpu.memory_space<vmem>>, vector<1x8x256xf32>
    %80 = vector.shape_cast %79 : vector<1x8x256xf32> to vector<8x256xf32>
    %cst_48 = arith.constant 0.000000e+00 : f32
    %81 = vector.shape_cast %12 : vector<1x256xi1> to vector<1x256xi1>
    %82 = vector.broadcast %81 : vector<1x256xi1> to vector<8x256xi1>
    %83 = vector.broadcast %cst_48 : f32 to vector<8x256xf32>
    %84 = arith.select %82, %80, %83 : vector<8x256xi1>, vector<8x256xf32>
    %85 = arith.truncf %84 : vector<8x256xf32> to vector<8x256xbf16>
    %86 = tpu.concatenate %78, %85 in 1 : vector<8x256xbf16>, vector<8x256xbf16> -> vector<8x512xbf16>
    %c0_49 = arith.constant 0 : index
    %c0_50 = arith.constant 0 : index
    %c143 = arith.constant 143 : index
    %87 = vector.load %arg7[%c0_49, %c0_50, %c143] : memref<2x8x512xf32, #tpu.memory_space<vmem>>, vector<1x8x256xf32>
    %88 = vector.shape_cast %87 : vector<1x8x256xf32> to vector<8x256xf32>
    %cst_51 = arith.constant 0.000000e+00 : f32
    %89 = vector.shape_cast %10 : vector<1x256xi1> to vector<1x256xi1>
    %90 = vector.broadcast %89 : vector<1x256xi1> to vector<8x256xi1>
    %91 = vector.broadcast %cst_51 : f32 to vector<8x256xf32>
    %92 = arith.select %90, %88, %91 : vector<8x256xi1>, vector<8x256xf32>
    %93 = arith.truncf %92 : vector<8x256xf32> to vector<8x256xbf16>
    %c1_52 = arith.constant 1 : index
    %c0_53 = arith.constant 0 : index
    %c143_54 = arith.constant 143 : index
    %94 = vector.load %arg7[%c1_52, %c0_53, %c143_54] : memref<2x8x512xf32, #tpu.memory_space<vmem>>, vector<1x8x256xf32>
    %95 = vector.shape_cast %94 : vector<1x8x256xf32> to vector<8x256xf32>
    %cst_55 = arith.constant 0.000000e+00 : f32
    %96 = vector.shape_cast %10 : vector<1x256xi1> to vector<1x256xi1>
    %97 = vector.broadcast %96 : vector<1x256xi1> to vector<8x256xi1>
    %98 = vector.broadcast %cst_55 : f32 to vector<8x256xf32>
    %99 = arith.select %97, %95, %98 : vector<8x256xi1>, vector<8x256xf32>
    %100 = arith.truncf %99 : vector<8x256xf32> to vector<8x256xbf16>
    %101 = tpu.concatenate %93, %100 in 1 : vector<8x256xbf16>, vector<8x256xbf16> -> vector<8x512xbf16>
    %c0_56 = arith.constant 0 : index
    %c0_57 = arith.constant 0 : index
    %c144 = arith.constant 144 : index
    %102 = vector.load %arg7[%c0_56, %c0_57, %c144] : memref<2x8x512xf32, #tpu.memory_space<vmem>>, vector<1x8x256xf32>
    %103 = vector.shape_cast %102 : vector<1x8x256xf32> to vector<8x256xf32>
    %104 = arith.truncf %103 : vector<8x256xf32> to vector<8x256xbf16>
    %c1_58 = arith.constant 1 : index
    %c0_59 = arith.constant 0 : index
    %c144_60 = arith.constant 144 : index
    %105 = vector.load %arg7[%c1_58, %c0_59, %c144_60] : memref<2x8x512xf32, #tpu.memory_space<vmem>>, vector<1x8x256xf32>
    %106 = vector.shape_cast %105 : vector<1x8x256xf32> to vector<8x256xf32>
    %107 = arith.truncf %106 : vector<8x256xf32> to vector<8x256xbf16>
    %108 = tpu.concatenate %104, %107 in 1 : vector<8x256xbf16>, vector<8x256xbf16> -> vector<8x512xbf16>
    %c0_61 = arith.constant 0 : index
    %c0_62 = arith.constant 0 : index
    %c145 = arith.constant 145 : index
    %109 = vector.load %arg7[%c0_61, %c0_62, %c145] : memref<2x8x512xf32, #tpu.memory_space<vmem>>, vector<1x8x256xf32>
    %110 = vector.shape_cast %109 : vector<1x8x256xf32> to vector<8x256xf32>
    %cst_63 = arith.constant 0.000000e+00 : f32
    %111 = vector.shape_cast %12 : vector<1x256xi1> to vector<1x256xi1>
    %112 = vector.broadcast %111 : vector<1x256xi1> to vector<8x256xi1>
    %113 = vector.broadcast %cst_63 : f32 to vector<8x256xf32>
    %114 = arith.select %112, %110, %113 : vector<8x256xi1>, vector<8x256xf32>
    %115 = arith.truncf %114 : vector<8x256xf32> to vector<8x256xbf16>
    %c1_64 = arith.constant 1 : index
    %c0_65 = arith.constant 0 : index
    %c145_66 = arith.constant 145 : index
    %116 = vector.load %arg7[%c1_64, %c0_65, %c145_66] : memref<2x8x512xf32, #tpu.memory_space<vmem>>, vector<1x8x256xf32>
    %117 = vector.shape_cast %116 : vector<1x8x256xf32> to vector<8x256xf32>
    %cst_67 = arith.constant 0.000000e+00 : f32
    %118 = vector.shape_cast %12 : vector<1x256xi1> to vector<1x256xi1>
    %119 = vector.broadcast %118 : vector<1x256xi1> to vector<8x256xi1>
    %120 = vector.broadcast %cst_67 : f32 to vector<8x256xf32>
    %121 = arith.select %119, %117, %120 : vector<8x256xi1>, vector<8x256xf32>
    %122 = arith.truncf %121 : vector<8x256xf32> to vector<8x256xbf16>
    %123 = tpu.concatenate %115, %122 in 1 : vector<8x256xbf16>, vector<8x256xbf16> -> vector<8x512xbf16>
    %124 = tpu.concatenate %27, %34, %49, %64, %71, %86, %101, %108, %123 in 0 : vector<8x512xbf16>, vector<8x512xbf16>, vector<8x512xbf16>, vector<8x512xbf16>, vector<8x512xbf16>, vector<8x512xbf16>, vector<8x512xbf16>, vector<8x512xbf16>, vector<8x512xbf16> -> vector<72x512xbf16>
    %c0_68 = arith.constant 0 : index
    %c0_69 = arith.constant 0 : index
    %125 = vector.load %arg2[%c0_68, %c0_69] : memref<32x72xbf16, #tpu.memory_space<vmem>>, vector<32x72xbf16>
    %cst_70 = arith.constant dense<0.000000e+00> : vector<32x512xf32>
    %126 = tpu.matmul %125, %124, %cst_70 {dimension_numbers = #tpu.dot_dimension_numbers<[1], [0], [0], [1], [0, 0, 1, 1], [], []>} : vector<32x72xbf16>, vector<72x512xbf16>, vector<32x512xf32> -> vector<32x512xf32>
    %c0_71 = arith.constant 0 : index
    %c0_72 = arith.constant 0 : index
    %127 = vector.load %arg3[%c0_71, %c0_72] : memref<32x1xf32, #tpu.memory_space<vmem>>, vector<32x1xf32>
    %128 = vector.broadcast %127 : vector<32x1xf32> to vector<32x512xf32>
    %129 = arith.addf %126, %128 : vector<32x512xf32>
    %cst_73 = arith.constant 0.000000e+00 : f32
    %130 = vector.broadcast %cst_73 : f32 to vector<32x512xf32>
    %131 = arith.maximumf %129, %130 : vector<32x512xf32>
    %c0_74 = arith.constant 0 : index
    %c0_75 = arith.constant 0 : index
    %132 = vector.load %arg4[%c0_74, %c0_75] : memref<8x32xbf16, #tpu.memory_space<vmem>>, vector<8x32xbf16>
    %133 = arith.truncf %131 : vector<32x512xf32> to vector<32x512xbf16>
    %cst_76 = arith.constant dense<0.000000e+00> : vector<8x512xf32>
    %134 = tpu.matmul %132, %133, %cst_76 {dimension_numbers = #tpu.dot_dimension_numbers<[1], [0], [0], [1], [0, 0, 1, 1], [], []>} : vector<8x32xbf16>, vector<32x512xbf16>, vector<8x512xf32> -> vector<8x512xf32>
    %135 = vector.extract_strided_slice %134 {offsets = [0, 0], sizes = [8, 256], strides = [1, 1]} : vector<8x512xf32> to vector<8x256xf32>
    %c0_77 = arith.constant 0 : index
    %c0_78 = arith.constant 0 : index
    %136 = vector.load %arg5[%c0_77, %c0_78] : memref<8x1xf32, #tpu.memory_space<vmem>>, vector<8x1xf32>
    %137 = vector.broadcast %136 : vector<8x1xf32> to vector<8x256xf32>
    %138 = arith.addf %135, %137 : vector<8x256xf32>
    %c0_79 = arith.constant 0 : index
    %c0_80 = arith.constant 0 : index
    %c0_81 = arith.constant 0 : index
    %139 = vector.load %arg1[%c0_79, %c0_80, %c0_81] : memref<2x8x256xf32, #tpu.memory_space<vmem>>, vector<1x8x256xf32>
    %140 = vector.shape_cast %139 : vector<1x8x256xf32> to vector<8x256xf32>
    %141 = arith.addf %138, %140 : vector<8x256xf32>
    %cst_82 = arith.constant 0.000000e+00 : f32
    %142 = vector.broadcast %cst_82 : f32 to vector<8x256xf32>
    %143 = arith.maximumf %141, %142 : vector<8x256xf32>
    %c0_83 = arith.constant 0 : index
    %c0_84 = arith.constant 0 : index
    %c0_85 = arith.constant 0 : index
    %144 = vector.load %arg6[%c0_83, %c0_84, %c0_85] : memref<2x8x256xf32, #tpu.memory_space<vmem>>, vector<1x8x256xf32>
    %145 = vector.shape_cast %144 : vector<1x8x256xf32> to vector<8x256xf32>
    %146 = vector.shape_cast %143 : vector<8x256xf32> to vector<1x8x256xf32>
    tpu.vector_store %arg6[%c0_83, %c0_84, %c0_85], %146 {strides = array<i32>} : memref<2x8x256xf32, #tpu.memory_space<vmem>>, vector<1x8x256xf32>,
    %147 = vector.extract_strided_slice %134 {offsets = [0, 256], sizes = [8, 256], strides = [1, 1]} : vector<8x512xf32> to vector<8x256xf32>
    %c0_86 = arith.constant 0 : index
    %c0_87 = arith.constant 0 : index
    %148 = vector.load %arg5[%c0_86, %c0_87] : memref<8x1xf32, #tpu.memory_space<vmem>>, vector<8x1xf32>
    %149 = vector.broadcast %148 : vector<8x1xf32> to vector<8x256xf32>
    %150 = arith.addf %147, %149 : vector<8x256xf32>
    %c1_88 = arith.constant 1 : index
    %c0_89 = arith.constant 0 : index
    %c0_90 = arith.constant 0 : index
    %151 = vector.load %arg1[%c1_88, %c0_89, %c0_90] : memref<2x8x256xf32, #tpu.memory_space<vmem>>, vector<1x8x256xf32>
    %152 = vector.shape_cast %151 : vector<1x8x256xf32> to vector<8x256xf32>
    %153 = arith.addf %150, %152 : vector<8x256xf32>
    %cst_91 = arith.constant 0.000000e+00 : f32
    %154 = vector.broadcast %cst_91 : f32 to vector<8x256xf32>
    %155 = arith.maximumf %153, %154 : vector<8x256xf32>
    %c1_92 = arith.constant 1 : index
    %c0_93 = arith.constant 0 : index
    %c0_94 = arith.constant 0 : index
    %156 = vector.load %arg6[%c1_92, %c0_93, %c0_94] : memref<2x8x256xf32, #tpu.memory_space<vmem>>, vector<1x8x256xf32>
    %157 = vector.shape_cast %156 : vector<1x8x256xf32> to vector<8x256xf32>
    %158 = vector.shape_cast %155 : vector<8x256xf32> to vector<1x8x256xf32>
    tpu.vector_store %arg6[%c1_92, %c0_93, %c0_94], %158 {strides = array<i32>} : memref<2x8x256xf32, #tpu.memory_space<vmem>>, vector<1x8x256xf32>,
    return
  }
  func.func @transform_0(%arg0: i32) -> (i32, i32, i32) {
    %c0_i32 = arith.constant 0 : i32
    %c0_i32_0 = arith.constant 0 : i32
    %c0_i32_1 = arith.constant 0 : i32
    return %arg0, %c0_i32, %c0_i32_0 : i32, i32, i32
  }
  func.func @transform_1(%arg0: i32) -> (i32, i32) {
    %c0_i32 = arith.constant 0 : i32
    %c0_i32_0 = arith.constant 0 : i32
    %c0_i32_1 = arith.constant 0 : i32
    return %c0_i32, %c0_i32_0 : i32, i32
  }
  func.func @transform_2(%arg0: i32) -> (i32, i32) {
    %c0_i32 = arith.constant 0 : i32
    %c0_i32_0 = arith.constant 0 : i32
    %c0_i32_1 = arith.constant 0 : i32
    return %c0_i32, %c0_i32_0 : i32, i32
  }
  func.func @transform_3(%arg0: i32) -> (i32, i32) {
    %c0_i32 = arith.constant 0 : i32
    %c0_i32_0 = arith.constant 0 : i32
    %c0_i32_1 = arith.constant 0 : i32
    return %c0_i32, %c0_i32_0 : i32, i32
  }
  func.func @transform_4(%arg0: i32) -> (i32, i32) {
    %c0_i32 = arith.constant 0 : i32
    %c0_i32_0 = arith.constant 0 : i32
    %c0_i32_1 = arith.constant 0 : i32
    return %c0_i32, %c0_i32_0 : i32, i32
  }
  func.func @transform_5(%arg0: i32) -> (i32, i32, i32) {
    %c0_i32 = arith.constant 0 : i32
    %c0_i32_0 = arith.constant 0 : i32
    %c0_i32_1 = arith.constant 0 : i32
    return %arg0, %c0_i32, %c0_i32_0 : i32, i32, i32
  }
}

</mosaic_0001>

<bundles_post_ra>
// kernel: tpu_custom_call.1
= control target key start
LH: loop header
LB: loop body
LE: loop exit
PB: predicated region body
PF: predicated region fallthrough
CT: control target
= control target key end

     0   :  { %10 = vsyncpa [#allocation4], 0  ;;  %s1152_s0 = inlined_call_operand.vmem [shape: f32[2,8,256], index: 0, kind: input, shape index: {}]   ;;  %s1153_s1 = inlined_call_operand.hbm [shape: bf16[32,72], index: 1, kind: input, shape index: {}]   ;;  %s1154_s2 = inlined_call_operand.vmem [shape: f32[32,1], index: 2, kind: input, shape index: {}]   ;;  %s1155_s3 = inlined_call_operand.vmem [shape: bf16[8,32], index: 3, kind: input, shape index: {}]   ;;  %s1156_s4 = inlined_call_operand.vmem [shape: f32[8,1], index: 4, kind: input, shape index: {}]   ;;  %s1157_s5 = inlined_call_operand.hbm [shape: f32[2,8,256], index: 5, kind: output, shape index: {}]  }
   0x1   :  { %11 = vsyncpa [#allocation5], 0  ;;  %s886_s18 = smov [#allocation3]  }
   0x2   :  { %s19_s19 = sshll.u32 %s886_s18, 4  ;;  %s20_s19 = int_to_ptr.vmem [resolvable:$true] %s19_s19 }
   0x3   :  { %s850_s20 = scalar_lea.vmem %s20_s19, 256  ;;  %p855_p1 = scmp.lt.s32.totalorder %s20_s19, %s20_s19 }
   0x4   :  { %p851_p0 = scmp.ne.s32.totalorder %s20_s19, %s850_s20  ;;  %p856_p2 = scmp.lt.s32.totalorder %s850_s20, %s850_s20 }
   0x6   :  { %p857_p3 = por %p856_p2, %p855_p1 }
   0x8   :  { %p858_p4 = pnand %p857_p3, %p851_p0 }
   0xa   :  { %861 = shalt.err (!%p858_p4)
}
   0xb   :  { %s887_s21 = smov 64   ;;  %s888_s22 = smov 4  }
   0xc   :  { %25 = dma.hbm_to_vmem [thread:$0]  %s1153_s1, 256, %s20_s19, [#allocation4], %s887_s21, %s887_s21, %s888_s22  }
   0xd   :  { %882 = dma.done.wait [#allocation4], 256  }
   0xe   :  { %883 = vsyncadd [#allocation4], 4294967040  ;;  %v938_v0 = vld [vmem:[%s1152_s0 + $0x18] sm:$0xff]  ;;  %v943_v1 = vld [vmem:[%s1152_s0] sm:$0xff]  ;;  %v889_v3 = vmov 0.0   ;;  %s890_s7 = smov 111   ;;  %v48_v22 = vlaneseq }
   0xf   :  { %v948_v2 = vld [vmem:[%s1152_s0 + $0x8] sm:$0xff]  ;;  %v758_v4 = vpack.i.bf16 %v889_v3, %v938_v0  ;;  %v956_v6 = vld [vmem:[%s1152_s0 + $0x10] sm:$0xff]  ;;  %s891_s8 = smov 113   ;;  %v892_v11 = vmov 0.0|0.0   ;;  %s893_s0 = smov 112   ;;  %v969_v12 = vpack.c.bf16 %v938_v0, %v938_v0  ;;  %v978_v14 = vpack.c.bf16 %v943_v1, %v943_v1  ;;  %v402_v17 = vld [vmem:[%s1154_s2 + $0x18] sm:$0xff] }
  0x10   :  { %v748_v5 = vpack.i.bf16 %v948_v2, %v943_v1  ;;  %v763_v7 = vpack.i.bf16 %v889_v3, %v948_v2  ;;  %v753_v8 = vpack.i.bf16 %v956_v6, %v889_v3  ;;  %v773_v9 = vpack.i.bf16 %v956_v6, %v943_v1  ;;  %s894_s9 = smov 127   ;;  %s895_s10 = smov 1   ;;  %v401_v18 = vld [vmem:[%s1154_s2 + $0x10] sm:$0xff]  ;;  %v399_v19 = vld [vmem:[%s1154_s2] sm:$0xff]  ;;  %v400_v20 = vld [vmem:[%s1154_s2 + $0x8] sm:$0xff] }
  0x11   :  { %759 = vrot.lane.b32.xlu1 %v758_v4, %s890_s7  ;;  %v964_v10 = vpack.c.bf16 %v948_v2, %v948_v2  ;;  %v974_v13 = vpack.c.bf16 %v956_v6, %v956_v6  ;;  %v798_v15 = vpack.i.bf16 %v938_v0, %v956_v6  ;;  %s896_s11 = smov 15   ;;  %s897_s12 = smov 17   ;;  %v899_v16 = vmov 0   ;;  %v669_v21 = vld [vmem:[%s1156_s4] sm:$0xff] }
  0x12   :  { %749 = vrot.lane.b32.xlu0 %v748_v5, %s890_s7  ;;  %s898_s13 = smov 16   ;;  %484 = vmatprep.mubr.bf16.mxu0 %v899_v16  ;;  %v1013_v23 = vand.u32 127, %v48_v22  ;;  %vm283_vm1 = vcmask 908288   ;;  %vm233_vm3 = vcmask 924672   ;;  %vm330_vm4 = vcmask 1043456   ;;  %v841_v22 = vld [vmem:[#allocation3 + $0x8] sm:$0xff]  }
  0x13   :  { %537 = vmatprep.mubr.bf16.mxu1 %v899_v16  ;;  %839 = vset.pattern.permute.xlu1 %v899_v16  ;;  %vm265_vm6 = vcmask 916480   ;;  %vm202_vm8 = vcmask 1039360   ;;  %vm171_vm9 = vcmask 7168   ;;  %vm142_vm10 = vcmask 121856  }
  0x14   :  { %838 = vset.pattern.permute.xlu0 %v899_v16  ;;  %v50_v24 = vadd.s32 128, %v1013_v23  ;;  %v51_v26 = vand.u32 15, %v1013_v23  ;;  %vm73_vm11 = vcmask 138240   ;;  %vm118_vm12 = vcmask 130048  }
  0x15   :  { %764 = vrot.lane.b32.xlu1 %v763_v7, %s891_s8  ;;  %vm433_vm13 = vcmask 588800   ;;  %vm583_vm14 = vcmask 261120  }
  0x16   :  { %754 = vrot.lane.b32.xlu0 %v753_v8, %s890_s7  ;;  %v52_v25 = vand.u32 15, %v50_v24  ;;  %vm1021_vm2 = vcmp.lt.s32.totalorder %v51_v26, 15  ;;  %vm1054_vm7 = vcmp.gt.s32.totalorder %v51_v26, 0 }
  0x18   :  { %vm1017_vm0 = vcmp.lt.s32.totalorder %v52_v25, 15  ;;  %vm1031_vm5 = vcmp.gt.s32.totalorder %v52_v25, 0 }
  0x19   :  { %774 = vrot.lane.b32.xlu1 %v773_v9, %s891_s8 }
  0x1a   :  { %769 = vrot.lane.b32.xlu0 %v758_v4, %s891_s8 }
  0x1d   :  { %263 = vrot.lane.b32.xlu1 %v892_v11, %s893_s0 }
  0x1e   :  { %261 = vrot.lane.b32.xlu0 %v964_v10, %s893_s0 }
  0x21   :  { %273 = vrot.lane.b32.xlu1 %v892_v11, %s893_s0 }
  0x22   :  { %271 = vrot.lane.b32.xlu0 %v969_v12, %s893_s0 }
  0x25   :  { %784 = vrot.lane.b32.xlu1 %v758_v4, %s894_s9 }
  0x26   :  { %779 = vrot.lane.b32.xlu0 %v763_v7, %s894_s9 }
  0x29   :  { %269 = vrot.lane.b32.xlu1 %v974_v13, %s893_s0 }
  0x2a   :  { %259 = vrot.lane.b32.xlu0 %v978_v14, %s893_s0 }
  0x2d   :  { %794 = vrot.lane.b32.xlu1 %v748_v5, %s895_s10 }
  0x2e   :  { %789 = vrot.lane.b32.xlu0 %v773_v9, %s894_s9 }
  0x31   :  { %804 = vrot.lane.b32.xlu1 %v889_v3, %s895_s10 }
  0x32   :  { %799 = vrot.lane.b32.xlu0 %v798_v15, %s895_s10 }
  0x35   :  { %814 = vrot.lane.b32.xlu1 %v798_v15, %s896_s11 }
  0x36   :  { %809 = vrot.lane.b32.xlu0 %v748_v5, %s896_s11 }
  0x39   :  { %824 = vrot.lane.b32.xlu1 %v748_v5, %s897_s12 }
  0x3a   :  { %819 = vrot.lane.b32.xlu0 %v889_v3, %s896_s11 }
  0x3d   :  { %834 = vrot.lane.b32.xlu1 %v889_v3, %s897_s12 }
  0x3e   :  { %829 = vrot.lane.b32.xlu0 %v798_v15, %s897_s12 }
  0x41   :  { %116 = vrot.lane.b32.xlu1 %v964_v10, %s898_s13 }
  0x42   :  { %114 = vrot.lane.b32.xlu0 %v978_v14, %s898_s13 }
  0x45   :  { %128 = vrot.lane.b32.xlu1 %v969_v12, %s898_s13 }
  0x46   :  { %126 = vrot.lane.b32.xlu0 %v974_v13, %s898_s13 }
  0x49   :  { %124 = vrot.lane.b32.xlu1 %v892_v11, %s898_s13 }
  0x4a   :  { %112 = vrot.lane.b32.xlu0 %v892_v11, %s898_s13 }
  0x4d   :  { %420 = vperm.xlu1 %839, %v402_v17  }
  0x4e   :  { %415 = vperm.xlu0 %838, %v401_v18  }
  0x51   :  { %405 = vperm.xlu1 %839, %v399_v19  }
  0x52   :  { %410 = vperm.xlu0 %838, %v400_v20  }
  0x55   :  { %672 = vperm.xlu1 %839, %v669_v21  }
  0x56   :  { %688 = vperm.xlu0 %838, %v669_v21  }
  0x83   :  { %v760_v27 = vpop.permute.xlu1 %759 }
  0x84   :  { %v750_v28 = vpop.permute.xlu0 %749  ;;  %v762_v31 = vunpack.i.h.bf16 %v760_v27  ;;  %v761_v32 = vunpack.i.l.bf16 %v760_v27 }
  0x85   :  { %v752_v33 = vunpack.i.h.bf16 %v750_v28  ;;  %v751_v34 = vunpack.i.l.bf16 %v750_v28 }
  0x86   :  { %v299_v35 = vsel %vm283_vm1, %v761_v32, %v762_v31 }
  0x87   :  { %v284_v36 = vsel %vm283_vm1, %v751_v34, %v752_v33  ;;  %v765_v37 = vpop.permute.xlu1 %764  ;;  %v303_v39 = vsel %vm1017_vm0, %v299_v35, 0.0 }
  0x88   :  { %v755_v38 = vpop.permute.xlu0 %754  ;;  %v288_v40 = vsel %vm1021_vm2, %v284_v36, 0.0  ;;  %v767_v41 = vunpack.i.h.bf16 %v765_v37  ;;  %v766_v42 = vunpack.i.l.bf16 %v765_v37  ;;  %v305_v45 = vpack.c.bf16 %v303_v39, %v303_v39 }
  0x89   :  { %v757_v43 = vunpack.i.h.bf16 %v755_v38  ;;  %v756_v44 = vunpack.i.l.bf16 %v755_v38  ;;  %v290_v53 = vpack.c.bf16 %v288_v40, %v288_v40 }
  0x8a   :  { %v235_v49 = vsel %vm233_vm3, %v766_v42, %v767_v41  ;;  %725 = vmatprep.subr.msk.bf16.mxu1 %vm330_vm4, %v305_v45 }
  0x8b   :  { %v285_v47 = vsel %vm283_vm1, %v752_v33, %v756_v44  ;;  %v298_v48 = vsel %vm283_vm1, %v757_v43, %v761_v32  ;;  %v775_v50 = vpop.permute.xlu1 %774  ;;  %v239_v59 = vsel %vm1031_vm5, %v235_v49, 0.0  ;;  %v441_v63 = vsel %vm330_vm4, %v290_v53, 0 }
  0x8c   :  { %v770_v51 = vpop.permute.xlu0 %769  ;;  %v289_v52 = vsel %vm1017_vm0, %v285_v47, 0.0  ;;  %v302_v54 = vsel %vm1021_vm2, %v298_v48, 0.0  ;;  %v241_v7 = vpack.c.bf16 %v239_v59, %v239_v59  ;;  %v777_v9 = vunpack.i.h.bf16 %v775_v50 }
  0x8d   :  { %v772_v55 = vunpack.i.h.bf16 %v770_v51  ;;  %v771_v56 = vunpack.i.l.bf16 %v770_v51  ;;  %v291_v57 = vpack.c.bf16 %v289_v52, %v289_v52  ;;  %v304_v58 = vpack.c.bf16 %v302_v54, %v302_v54 }
  0x8e   :  { %v776_v11 = vunpack.i.l.bf16 %v775_v50 }
  0x8f   :  { %v249_v60 = vsel %vm233_vm3, %v771_v56, %v772_v55  ;;  %722 = vmatprep.subr.msk.bf16.mxu0 %vm330_vm4, %v291_v57  ;;  %v264_v61 = vpop.permute.xlu1 %263  ;;  %v447_v3 = vsel %vm330_vm4, %v304_v58, 0  ;;  %v248_v24 = vsel %vm233_vm3, %v777_v9, %v771_v56 }
  0x90   :  { %v262_v62 = vpop.permute.xlu0 %261  ;;  %459 = vmatpush1.bf16.msra.mxu0 %v441_v63  ;;  %512 = vmatpush1.bf16.msra.mxu1 %v447_v3  ;;  %v253_v8 = vsel %vm1031_vm5, %v249_v60, 0.0  ;;  %v234_v23 = vsel %vm233_vm3, %v776_v11, %v766_v42  ;;  %v252_v37 = vsel %vm1054_vm7, %v248_v24, 0.0 }
  0x91   :  { %v267_v4 = vsel %vm265_vm6, %v262_v62, %v264_v61  ;;  %v255_v21 = vpack.c.bf16 %v253_v8, %v253_v8  ;;  %v238_v36 = vsel %vm1054_vm7, %v234_v23, 0.0  ;;  %v254_v50 = vpack.c.bf16 %v252_v37, %v252_v37 }
  0x92   :  { %v327_v5 = vrot.slane %v267_v4, 4  ;;  %v240_v49 = vpack.c.bf16 %v238_v36, %v238_v36 }
  0x93   :  { %v274_v15 = vpop.permute.xlu1 %273 }
  0x94   :  { %v272_v17 = vpop.permute.xlu0 %271  ;;  %v385_v18 = vsel %vm330_vm4, %v241_v7, %v327_v5 }
  0x95   :  { %v276_v19 = vsel %vm265_vm6, %v272_v17, %v274_v15  ;;  %460 = vmatprep.subr.bf16.mxu0 %v385_v18 }
  0x96   :  { %v329_v20 = vrot.slane %v276_v19, 4 }
  0x97   :  { %v785_v25 = vpop.permute.xlu1 %784 }
  0x98   :  { %v780_v27 = vpop.permute.xlu0 %779  ;;  %v393_v28 = vsel %vm330_vm4, %v255_v21, %v329_v20  ;;  %v787_v31 = vunpack.i.h.bf16 %v785_v25  ;;  %v786_v32 = vunpack.i.l.bf16 %v785_v25 }
  0x99   :  { %v782_v33 = vunpack.i.h.bf16 %v780_v27  ;;  %v781_v34 = vunpack.i.l.bf16 %v780_v27  ;;  %513 = vmatprep.subr.bf16.mxu1 %v393_v28 }
  0x9a   :  { %v220_v35 = vsel %vm202_vm8, %v786_v32, %v787_v31 }
  0x9b   :  { %v204_v26 = vsel %vm202_vm8, %v781_v34, %v782_v33  ;;  %v270_v38 = vpop.permute.xlu1 %269  ;;  %v224_v41 = vsel %vm1017_vm0, %v220_v35, 0.0 }
  0x9c   :  { %v260_v39 = vpop.permute.xlu0 %259  ;;  %v208_v40 = vsel %vm1017_vm0, %v204_v26, 0.0  ;;  %v275_v42 = vsel %vm265_vm6, %v270_v38, %v272_v17  ;;  %v226_v45 = vpack.c.bf16 %v224_v41, %v224_v41 }
  0x9d   :  { %v266_v43 = vsel %vm265_vm6, %v260_v39, %v262_v62  ;;  %v210_v44 = vpack.c.bf16 %v208_v40, %v208_v40  ;;  %v328_v47 = vrot.slane %v275_v42, 4 }
  0x9e   :  { %v326_v48 = vrot.slane %v266_v43, 4  ;;  %v325_v52 = vrot.slane %v226_v45, 4 }
  0x9f   :  { %v323_v51 = vrot.slane %v210_v44, 4  ;;  %v795_v53 = vpop.permute.xlu1 %794  ;;  %v389_v56 = vsel %vm330_vm4, %v254_v50, %v328_v47 }
  0xa0   :  { %v790_v54 = vpop.permute.xlu0 %789  ;;  %v381_v55 = vsel %vm330_vm4, %v240_v49, %v326_v48  ;;  %v797_v57 = vunpack.i.h.bf16 %v795_v53  ;;  %v796_v58 = vunpack.i.l.bf16 %v795_v53  ;;  %514 = vmatpush1.bf16.msra.mxu1 %v389_v56  ;;  %v377_v62 = vsel %vm330_vm4, %v969_v12, %v325_v52 }
  0xa1   :  { %v792_v59 = vunpack.i.h.bf16 %v790_v54  ;;  %v791_v60 = vunpack.i.l.bf16 %v790_v54  ;;  %461 = vmatpush1.bf16.msra.mxu0 %v381_v55  ;;  %v369_v61 = vsel %vm330_vm4, %v964_v10, %v323_v51  ;;  %515 = vmatprep.subr.bf16.mxu1 %v377_v62 }
  0xa2   :  { %v173_v63 = vsel %vm171_vm9, %v796_v58, %v797_v57  ;;  %462 = vmatprep.subr.bf16.mxu0 %v369_v61 }
  0xa3   :  { %v219_v3 = vsel %vm202_vm8, %v792_v59, %v786_v32  ;;  %v203_v4 = vsel %vm202_vm8, %v791_v60, %v781_v34  ;;  %v805_v5 = vpop.permute.xlu1 %804  ;;  %v177_v10 = vsel %vm1031_vm5, %v173_v63, 0.0 }
  0xa4   :  { %v800_v7 = vpop.permute.xlu0 %799  ;;  %v207_v8 = vsel %vm1021_vm2, %v203_v4, 0.0  ;;  %v223_v9 = vsel %vm1021_vm2, %v219_v3, 0.0  ;;  %v807_v12 = vunpack.i.h.bf16 %v805_v5  ;;  %v806_v11 = vunpack.i.l.bf16 %v805_v5 }
  0xa5   :  { %v802_v15 = vunpack.i.h.bf16 %v800_v7  ;;  %v801_v17 = vunpack.i.l.bf16 %v800_v7  ;;  %v209_v18 = vpack.c.bf16 %v207_v8, %v207_v8  ;;  %v225_v19 = vpack.c.bf16 %v223_v9, %v223_v9 }
  0xa6   :  { %v172_v20 = vsel %vm171_vm9, %v806_v11, %v796_v58  ;;  %v179_v23 = vpack.c.bf16 %v177_v10, %v177_v10 }
  0xa7   :  { %v187_v21 = vsel %vm171_vm9, %v801_v17, %v802_v15  ;;  %v186_v24 = vsel %vm171_vm9, %v807_v12, %v801_v17  ;;  %v815_v25 = vpop.permute.xlu1 %814  ;;  %v322_v28 = vrot.slane %v209_v18, 4  ;;  %v324_v31 = vrot.slane %v225_v19, 4 }
  0xa8   :  { %v810_v27 = vpop.permute.xlu0 %809  ;;  %v191_v32 = vsel %vm1031_vm5, %v187_v21, 0.0  ;;  %v817_v33 = vunpack.i.h.bf16 %v815_v25  ;;  %v816_v34 = vunpack.i.l.bf16 %v815_v25  ;;  %v176_v39 = vsel %vm1054_vm7, %v172_v20, 0.0 }
  0xa9   :  { %v812_v35 = vunpack.i.h.bf16 %v810_v27  ;;  %v811_v26 = vunpack.i.l.bf16 %v810_v27  ;;  %v365_v36 = vsel %vm330_vm4, %v978_v14, %v322_v28  ;;  %v373_v37 = vsel %vm330_vm4, %v974_v13, %v324_v31 }
  0xaa   :  { %v193_v38 = vpack.c.bf16 %v191_v32, %v191_v32  ;;  %v158_v40 = vsel %vm142_vm10, %v816_v34, %v817_v33  ;;  %463 = vmatpush1.bf16.msra.mxu0 %v365_v36  ;;  %516 = vmatpush1.bf16.msra.mxu1 %v373_v37  ;;  %v190_v42 = vsel %vm1054_vm7, %v186_v24, 0.0  ;;  %v315_v13 = vrot.slane %v179_v23, 4 }
  0xab   :  { %v144_v41 = vsel %vm142_vm10, %v811_v26, %v812_v35  ;;  %v825_v43 = vpop.permute.xlu1 %824  ;;  %v162_v45 = vsel %vm1017_vm0, %v158_v40, 0.0  ;;  %v178_v47 = vpack.c.bf16 %v176_v39, %v176_v39  ;;  %v192_v55 = vpack.c.bf16 %v190_v42, %v190_v42 }
  0xac   :  { %v820_v44 = vpop.permute.xlu0 %819  ;;  %v148_v14 = vsel %vm1017_vm0, %v144_v41, 0.0  ;;  %v827_v48 = vunpack.i.h.bf16 %v825_v43  ;;  %v826_v49 = vunpack.i.l.bf16 %v825_v43  ;;  %v164_v53 = vpack.c.bf16 %v162_v45, %v162_v45  ;;  %v840_v45 = vld [vmem:[#allocation3] sm:$0xff]  }
  0xad   :  { %v822_v50 = vunpack.i.h.bf16 %v820_v44  ;;  %v821_v51 = vunpack.i.l.bf16 %v820_v44  ;;  %v150_v52 = vpack.c.bf16 %v148_v14, %v148_v14  ;;  %v317_v54 = vrot.slane %v193_v38, 4 }
  0xae   :  { %v75_v56 = vsel %vm73_vm11, %v826_v49, %v827_v48  ;;  %v314_v7 = vrot.slane %v178_v47, 4  ;;  %v316_v9 = vrot.slane %v192_v55, 4 }
  0xaf   :  { %v157_v57 = vsel %vm142_vm10, %v822_v50, %v816_v34  ;;  %v143_v58 = vsel %vm142_vm10, %v821_v51, %v811_v26  ;;  %v835_v59 = vpop.permute.xlu1 %834  ;;  %v353_v29 = vsel %vm330_vm4, %v150_v52, %v315_v13  ;;  %v361_v61 = vsel %vm330_vm4, %v164_v53, %v317_v54 }
  0xb0   :  { %v830_v60 = vpop.permute.xlu0 %829  ;;  %v147_v62 = vsel %vm1021_vm2, %v143_v58, 0.0  ;;  %v161_v63 = vsel %vm1021_vm2, %v157_v57, 0.0  ;;  %464 = vmatprep.subr.bf16.mxu0 %v353_v29  ;;  %517 = vmatprep.subr.bf16.mxu1 %v361_v61  ;;  %v837_v10 = vunpack.i.h.bf16 %v835_v59  ;;  %v79_v12 = vsel %vm1031_vm5, %v75_v56, 0.0 }
  0xb1   :  { %v832_v3 = vunpack.i.h.bf16 %v830_v60  ;;  %v831_v4 = vunpack.i.l.bf16 %v830_v60  ;;  %v149_v5 = vpack.c.bf16 %v147_v62, %v147_v62  ;;  %v163_v8 = vpack.c.bf16 %v161_v63, %v161_v63 }
  0xb2   :  { %v836_v11 = vunpack.i.l.bf16 %v835_v59  ;;  %v81_v23 = vpack.c.bf16 %v79_v12, %v79_v12 }
  0xb3   :  { %v96_v15 = vsel %vm73_vm11, %v831_v4, %v832_v3  ;;  %v117_v17 = vpop.permute.xlu1 %116  ;;  %v349_v30 = vsel %vm330_vm4, %v149_v5, %v314_v7  ;;  %v357_v19 = vsel %vm330_vm4, %v163_v8, %v316_v9  ;;  %v95_v27 = vsel %vm73_vm11, %v837_v10, %v831_v4 }
  0xb4   :  { %v115_v18 = vpop.permute.xlu0 %114  ;;  %465 = vmatpush1.bf16.msra.mxu0 %v349_v30  ;;  %518 = vmatpush1.bf16.msra.mxu1 %v357_v19  ;;  %v100_v24 = vsel %vm1031_vm5, %v96_v15, 0.0  ;;  %v74_v25 = vsel %vm73_vm11, %v836_v11, %v826_v49  ;;  %v99_v46 = vsel %vm1054_vm7, %v95_v27, 0.0 }
  0xb5   :  { %v120_v20 = vsel %vm118_vm12, %v115_v18, %v117_v17  ;;  %v102_v35 = vpack.c.bf16 %v100_v24, %v100_v24  ;;  %v78_v26 = vsel %vm1054_vm7, %v74_v25, 0.0  ;;  %v101_v44 = vpack.c.bf16 %v99_v46, %v99_v46 }
  0xb6   :  { %v307_v21 = vrot.slane %v120_v20, 4  ;;  %v80_v43 = vpack.c.bf16 %v78_v26, %v78_v26 }
  0xb7   :  { %v129_v28 = vpop.permute.xlu1 %128 }
  0xb8   :  { %v127_v31 = vpop.permute.xlu0 %126  ;;  %v337_v32 = vsel %vm330_vm4, %v81_v23, %v307_v21 }
  0xb9   :  { %v131_v33 = vsel %vm118_vm12, %v127_v31, %v129_v28  ;;  %466 = vmatprep.subr.bf16.mxu0 %v337_v32 }
  0xba   :  { %v309_v34 = vrot.slane %v131_v33, 4 }
  0xbb   :  { %v125_v36 = vpop.permute.xlu1 %124 }
  0xbc   :  { %v113_v37 = vpop.permute.xlu0 %112  ;;  %v345_v38 = vsel %vm330_vm4, %v102_v35, %v309_v34  ;;  %v130_v39 = vsel %vm118_vm12, %v125_v36, %v127_v31 }
  0xbd   :  { %v119_v40 = vsel %vm118_vm12, %v113_v37, %v115_v18  ;;  %519 = vmatprep.subr.bf16.mxu1 %v345_v38  ;;  %v308_v41 = vrot.slane %v130_v39, 4 }
  0xbe   :  { %v306_v42 = vrot.slane %v119_v40, 4 }
  0xbf   :  { %v341_v13 = vsel %vm330_vm4, %v101_v44, %v308_v41 }
  0xc0   :  { %v333_v14 = vsel %vm330_vm4, %v80_v43, %v306_v42  ;;  %520 = vmatpush1.bf16.msra.mxu1 %v341_v13 }
  0xc1   :  { %467 = vmatpush1.bf16.msra.mxu0 %v333_v14 }
  0xc3   :  { %726 = vmatmul.mubr.msk.bf16.vlgmr.msra.gmra.mxu1 %vm433_vm13, %v840_v45 }
  0xc4   :  { %723 = vmatmul.mubr.msk.bf16.vlgmr.msra.gmra.mxu0 %vm433_vm13, %v840_v45  ;;  %547 = vmatprep.mubr.bf16.mxu1 %v899_v16 }
  0xc5   :  { %494 = vmatprep.mubr.bf16.mxu0 %v899_v16 }
  0xc8   :  { %v421_v56 = vpop.permute.xlu1 %420 }
  0xc9   :  { %v416_v53 = vpop.permute.xlu0 %415 }
  0xcb   :  { %727 = vmatmul.mubr.msk.bf16.gmra.mxu1 %vm433_vm13, %v841_v22 }
  0xcc   :  { %724 = vmatmul.mubr.msk.bf16.gmra.mxu0 %vm433_vm13, %v841_v22  ;;  %660 = vmatprep.mubr.bf16.mxu1 %v899_v16 }
  0xcd   :  { %619 = vmatprep.mubr.bf16.mxu0 %v899_v16  ;;  %v411_v29 = vpop.permute.xlu0 %410  ;;  %v406_v16 = vpop.permute.xlu1 %405 }
 0x183   :  { %v539_v48 = vpop.f32.mrf.mxu1 }
 0x184   :  { %v486_v47 = vpop.f32.mrf.mxu0  ;;  %v540_v34 = vadd.f32 %v539_v48, %v406_v16  ;;  %v673_v48 = vpop.permute.xlu1 %672 }
 0x185   :  { %v541_v50 = vpop.f32.mrf.mxu1  ;;  %v487_v33 = vadd.f32 %v486_v47, %v406_v16  ;;  %v574_v47 = vld [vmem:[%s1155_s3] sm:$0xf]  ;;  %s900_s3 = smov [#allocation6]  }
 0x186   :  { %v488_v49 = vpop.f32.mrf.mxu0  ;;  %v542_v10 = vadd.f32 %v541_v50, %v406_v16  ;;  %v560_v13 = vmax.f32 %v540_v34, 0.0  ;;  %s708_s24 = sshll.u32 %s900_s3, 4  ;;  %s709_s24 = int_to_ptr.vmem [resolvable:$true] %s708_s24 }
 0x187   :  { %v543_v52 = vpop.f32.mrf.mxu1  ;;  %v489_v9 = vadd.f32 %v488_v49, %v406_v16  ;;  %v558_v14 = vmax.f32 %v487_v33, 0.0  ;;  %v689_v49 = vpop.permute.xlu0 %688  ;;  %s862_s25 = scalar_lea.vmem %s709_s24, 512  ;;  %p867_p6 = scmp.lt.s32.totalorder %s709_s24, %s709_s24 }
 0x188   :  { %v490_v51 = vpop.f32.mrf.mxu0  ;;  %v544_v30 = vadd.f32 %v543_v52, %v411_v29  ;;  %v561_v36 = vmax.f32 %v542_v10, 0.0  ;;  %p863_p5 = scmp.ne.s32.totalorder %s709_s24, %s862_s25  ;;  %p868_p7 = scmp.lt.s32.totalorder %s862_s25, %s862_s25 }
 0x189   :  { %v545_v55 = vpop.f32.mrf.mxu1  ;;  %v491_v18 = vadd.f32 %v490_v51, %v411_v29  ;;  %v559_v46 = vmax.f32 %v489_v9, 0.0 }
 0x18a   :  { %v492_v54 = vpop.f32.mrf.mxu0  ;;  %v546_v62 = vadd.f32 %v545_v55, %v411_v29  ;;  %v564_v40 = vmax.f32 %v544_v30, 0.0  ;;  %p869_p8 = por %p868_p7, %p867_p6 }
 0x18b   :  { %v549_v58 = vpop.f32.mrf.mxu1  ;;  %v493_v61 = vadd.f32 %v492_v54, %v411_v29  ;;  %v562_v39 = vmax.f32 %v491_v18, 0.0 }
 0x18c   :  { %v496_v57 = vpop.f32.mrf.mxu0  ;;  %v550_v11 = vadd.f32 %v549_v58, %v416_v53  ;;  %v565_v23 = vmax.f32 %v546_v62, 0.0  ;;  %v577_v22 = vpack.c.bf16 %v564_v40, %v560_v13  ;;  %p870_p9 = pnand %p869_p8, %p863_p5 }
 0x18d   :  { %v551_v60 = vpop.f32.mrf.mxu1  ;;  %v497_v12 = vadd.f32 %v496_v57, %v416_v53  ;;  %v563_v21 = vmax.f32 %v493_v61, 0.0  ;;  %v575_v45 = vpack.c.bf16 %v562_v39, %v558_v14 }
 0x18e   :  { %v498_v59 = vpop.f32.mrf.mxu0  ;;  %v552_v5 = vadd.f32 %v551_v60, %v416_v53  ;;  %v568_v26 = vmax.f32 %v550_v11, 0.0  ;;  %v578_v44 = vpack.c.bf16 %v565_v23, %v561_v36 }
 0x18f   :  { %v553_v3 = vpop.f32.mrf.mxu1  ;;  %v499_v4 = vadd.f32 %v498_v59, %v416_v53  ;;  %v566_v35 = vmax.f32 %v497_v12, 0.0  ;;  %v576_v43 = vpack.c.bf16 %v563_v21, %v559_v46 }
 0x190   :  { %v500_v63 = vpop.f32.mrf.mxu0  ;;  %v554_v8 = vadd.f32 %v553_v3, %v421_v56  ;;  %v569_v28 = vmax.f32 %v552_v5, 0.0 }
 0x191   :  { %v501_v7 = vadd.f32 %v500_v63, %v421_v56  ;;  %v555_v17 = vpop.f32.mrf.mxu1  ;;  %v567_v27 = vmax.f32 %v499_v4, 0.0 }
 0x192   :  { %v502_v15 = vpop.f32.mrf.mxu0  ;;  %v556_v20 = vadd.f32 %v555_v17, %v421_v56  ;;  %v572_v25 = vmax.f32 %v554_v8, 0.0 }
 0x193   :  { %v503_v19 = vadd.f32 %v502_v15, %v421_v56  ;;  %v570_v24 = vmax.f32 %v501_v7, 0.0 }
 0x194   :  { %v573_v32 = vmax.f32 %v556_v20, 0.0  ;;  %v581_v42 = vpack.c.bf16 %v572_v25, %v568_v26 }
 0x195   :  { %v571_v31 = vmax.f32 %v503_v19, 0.0  ;;  %v579_v41 = vpack.c.bf16 %v570_v24, %v566_v35 }
 0x196   :  { %v582_v38 = vpack.c.bf16 %v573_v32, %v569_v28 }
 0x197   :  { %v580_v37 = vpack.c.bf16 %v571_v31, %v567_v27 }
 0x198   :  { %640 = vmatprep.subr.bf16.mxu1 %v582_v38 }
 0x199   :  { %599 = vmatprep.subr.bf16.mxu0 %v580_v37  ;;  %641 = vmatpush1.bf16.msra.mxu1 %v581_v42 }
 0x19a   :  { %600 = vmatpush1.bf16.msra.mxu0 %v579_v41  ;;  %642 = vmatprep.subr.bf16.mxu1 %v578_v44 }
 0x19b   :  { %601 = vmatprep.subr.bf16.mxu0 %v576_v43 }
 0x19d   :  { %643 = vmatpush1.bf16.msra.mxu1 %v577_v22 }
 0x19e   :  { %602 = vmatpush1.bf16.msra.mxu0 %v575_v45 }
 0x1a0   :  { %729 = vmatmul.mubr.msk.bf16.vlgmr.msra.gmra.mxu1 %vm583_vm14, %v574_v47 }
 0x1a1   :  { %728 = vmatmul.mubr.msk.bf16.vlgmr.msra.gmra.mxu0 %vm583_vm14, %v574_v47 }
 0x260   :  { %v662_v51 = vpop.f32.mrf.mxu1 }
 0x261   :  { %v621_v50 = vpop.f32.mrf.mxu0  ;;  %v691_v53 = vadd.f32 %v689_v49, %v662_v51 }
 0x262   :  { %v675_v52 = vadd.f32 %v673_v48, %v621_v50  ;;  %v664_v55 = vpop.f32.mrf.mxu1 }
 0x263   :  { %v623_v54 = vpop.f32.mrf.mxu0  ;;  %v696_v57 = vadd.f32 %v691_v53, %v956_v6  ;;  %v692_v59 = vadd.f32 %v689_v49, %v664_v55 }
 0x264   :  { %v679_v56 = vadd.f32 %v675_v52, %v943_v1  ;;  %v676_v58 = vadd.f32 %v673_v48, %v623_v54  ;;  %v666_v29 = vpop.f32.mrf.mxu1 }
 0x265   :  { %v625_v60 = vpop.f32.mrf.mxu0  ;;  %v698_v62 = vmax.f32 %v696_v57, 0.0  ;;  %v697_v3 = vadd.f32 %v692_v59, %v938_v0 }
 0x266   :  { %v681_v61 = vmax.f32 %v679_v56, 0.0  ;;  %v680_v63 = vadd.f32 %v676_v58, %v948_v2  ;;  %v667_v4 = vpop.f32.mrf.mxu1 }
 0x267   :  { %v626_v16 = vpop.f32.mrf.mxu0  ;;  %701 = vst [vmem:[#allocation6 + $0x10] sm:$0xff] %v698_v62  ;;  %v699_v1 = vmax.f32 %v697_v3, 0.0 }
 0x268   :  { %683 = vst [vmem:[#allocation6] sm:$0xff] %v681_v61  ;;  %v682_v5 = vmax.f32 %v680_v63, 0.0 }
 0x269   :  { %702 = vst [vmem:[#allocation6 + $0x18] sm:$0xff] %v699_v1 }
 0x26a   :  { %684 = vst [vmem:[#allocation6 + $0x8] sm:$0xff] %v682_v5 }
 0x26b   :  { %873 = shalt.err (!%p870_p9)
}
 0x26c   :  { %s901_s26 = smov 256  }
 0x26d   :  { %714 = dma.vmem_to_hbm [thread:$0]  %s709_s24, 512, %s1157_s5, [#allocation5], %s901_s26, %s901_s26, %s898_s13  }
 0x26e   :  { %884 = dma.done.wait [#allocation5], 512  }
 0x26f   :  { %885 = vsyncadd [#allocation5], 4294966784 }
 0x270   :  { %718 = vsyncpa [#allocation4], 1 }
 0x271   :  { %719 = vsyncpa [#allocation5], 1 }

</bundles_post_ra>
